<compile_context>
chip_gen: v5e
topology: v5e:2x2
jax: 0.10.0
libtpu: 0.0.40
codegen_flags: <defaults>
</compile_context>

<pallas_src>
from functools import partial

import jax
import jax.numpy as jnp
from jax import lax
from jax.experimental import pallas as pl
from jax.experimental.pallas import tpu as pltpu

EPS = 1e-6


# ---------------------------------------------------------------------------
# Single fused kernel: backbone patch-embedding (both images) -> feature L2
# norm -> correlation (MXU) -> relu -> per-column L2 norm -> both heads.
# One grid step per batch element.
# ---------------------------------------------------------------------------
def _fused_kernel(patches_ref, wp_ref, bp_ref, wh_ref, bh_ref, out_ref,
                  *, P, Q, n_heads):
    # Backbone stand-in: one shared patch-projection matmul + relu for BOTH
    # images (source + target patches stacked along the 2P axis -> single MXU
    # call with a lane-dense (K, 2P) LHS).
    # TODO(synk): pretrained ResNet50 internals are unavailable; deterministic
    #             2x2 patch-projection stand-in instead.
    patches = patches_ref[0]                                        # (K, 2P) bf16
    feat = lax.dot_general(patches, wp_ref[...],
                           (((0,), (0,)), ((), ())),
                           preferred_element_type=jnp.float32)      # (2P, F) f32
    feat = jnp.maximum(feat + bp_ref[...], 0.0)

    s = feat[:P, :]                                                 # (P, F) source
    t = feat[P:, :]                                                 # (Q, F) target

    # feature_l2_norm over channels (F on the lane axis); rsqrt on the EUP
    # with EPS folded replaces sqrt + divide of the reference.
    s = s * lax.rsqrt(jnp.sum(s * s, axis=1, keepdims=True) + EPS * EPS)
    t = t * lax.rsqrt(jnp.sum(t * t, axis=1, keepdims=True) + EPS * EPS)

    # einsum('bfhw,bfxy->bwhxy') flattened to (P, Q): contract shared F axis.
    c = lax.dot_general(s.astype(jnp.bfloat16), t.astype(jnp.bfloat16),
                        (((1,), (1,)), ((), ())),
                        preferred_element_type=jnp.float32)         # (P, Q) f32

    # feature_l2_norm(relu(corr)) over dim=1 == over P == per column of c.
    c = jnp.maximum(c, 0.0)
    c = c * lax.rsqrt(jnp.sum(c * c, axis=0, keepdims=True) + EPS * EPS)

    # Fused heads: y[n] = sum_{p,q} c[p,q] * W[n,p,q] + b[n].  PQ x 7 MACs per
    # batch element -> VPU multiply + full reduce; avoids an in-kernel lane
    # relayout of c and any HBM round trip of the correlation map.
    # TODO(synk): CorrelationMapTransformPredictor / FeatureMatcherHead
    #             internals are not provided; stand-in fused linear heads.
    col = lax.broadcasted_iota(jnp.int32, (1, 8), 1)
    y = jnp.zeros((1, 8), jnp.float32)
    for n in range(n_heads):          # cols 0..5 transform, col 6 match, 7 pad
        h_n = jnp.sum(c * wh_ref[n].astype(jnp.float32),
                      axis=(0, 1), keepdims=True)                   # (1, 1)
        y = jnp.where(col == n, h_n, y)
    y = y + bh_ref[...]
    # Column 6 = match probability logit -> sigmoid; others stay linear.
    out_ref[0] = jnp.where(col == 6, jax.nn.sigmoid(y), y)


def fused_forward(patches, w_patch, b_patch, w_heads, b_heads, *, P, Q):
    B, K, twoP = patches.shape
    F = w_patch.shape[1]
    NH = w_heads.shape[0]
    return pl.pallas_call(
        partial(_fused_kernel, P=P, Q=Q, n_heads=NH),
        out_shape=jax.ShapeDtypeStruct((B, 1, 8), jnp.float32),
        grid=(B,),
        in_specs=[
            pl.BlockSpec((1, K, twoP), lambda b: (b, 0, 0)),   # patches (bf16)
            pl.BlockSpec((K, F), lambda b: (0, 0)),            # w_patch (bf16)
            pl.BlockSpec((1, F), lambda b: (0, 0)),            # b_patch (f32)
            pl.BlockSpec((NH, P, Q), lambda b: (0, 0, 0)),     # w_heads (bf16)
            pl.BlockSpec((1, 8), lambda b: (0, 0)),            # b_heads (f32)
        ],
        out_specs=pl.BlockSpec((1, 1, 8), lambda b: (b, 0, 0)),
        compiler_params=pltpu.CompilerParams(
            # "parallel" shards the batch axis across v7x's two TensorCores;
            # VMEM usage is <1 MiB so the explicit limit is generous on all
            # generations (v7x physical VMEM is only 64 MiB).
            dimension_semantics=("parallel",),
            vmem_limit_bytes=16 * 1024 * 1024),
    )(patches, w_patch, b_patch, w_heads, b_heads)


# ---------------------------------------------------------------------------
# Wrapper.
# ---------------------------------------------------------------------------
def _extract_patches(x, order):
    # 2x2 non-overlapping patches (backbone stride-2 stand-in).
    B, C, H, W = x.shape
    h, w = H // 2, W // 2
    x = x.reshape(B, C, h, 2, w, 2)
    if order == "wh":            # row p = w*h1 + h  (matches 'bwhxy' flatten)
        x = x.transpose(0, 4, 2, 1, 3, 5)
    else:                        # row q = x*w2 + y  (row-major h, w)
        x = x.transpose(0, 2, 4, 1, 3, 5)
    return x.reshape(B, h * w, C * 4)


def sm_net_corr_forward(params, x1, x2):
    B, C, H, W = x1.shape
    h, w = H // 2, W // 2
    P = Q = h * w

    # TODO(synk): at real resolutions express the 2x2 patching via BlockSpec
    #             index_map / strided reads instead of this XLA transpose.
    p1 = _extract_patches(x1, "wh")                  # source rows: p = w*h1 + h
    p2 = _extract_patches(x2, "hw")                  # target rows: q = x*w2 + y
    patches = jnp.concatenate([p1, p2], axis=1)      # (B, 2P, K)
    # Lane-dense (B, K, 2P) bf16 slab (K=C*4 stays the contraction dim).
    patches = patches.transpose(0, 2, 1).astype(jnp.bfloat16)

    heads = fused_forward(patches, params["w_patch"], params["b_patch"],
                          params["w_heads"], params["b_heads"],
                          P=P, Q=Q)                  # (B, 1, 8)
    heads = heads[:, 0, :]
    match_prob = heads[:, 6:7]
    transform_pred = heads[:, :6]
    return match_prob, transform_pred


# ---------------------------------------------------------------------------
# Deterministic parameter init + example run.
# ---------------------------------------------------------------------------
def init_params(key, c_in, feat_dim, h, w):
    k1, k2, k3 = jax.random.split(key, 3)
    K = c_in * 4
    P = Q = h * w
    F_PAD = 128   # lane-dense feature dim; columns >= feat_dim stay zero.
    w_patch = jnp.zeros((K, F_PAD), jnp.float32).at[:, :feat_dim].set(
        jax.random.normal(k1, (K, feat_dim), jnp.float32) * 0.1)
    # Heads as dense (7, P, Q): planes 0..5 transform head, plane 6 match head.
    w_heads = jnp.concatenate(
        [jax.random.normal(k2, (6, P, Q), jnp.float32) * 0.02,
         jax.random.normal(k3, (1, P, Q), jnp.float32) * 0.02], axis=0)
    return {
        # Pre-cast to bf16 in the wrapper (halves weight DMA; f32 accumulate
        # happens in-kernel via preferred_element_type).
        "w_patch": w_patch.astype(jnp.bfloat16),
        "b_patch": jnp.zeros((1, F_PAD), jnp.float32),
        "w_heads": w_heads.astype(jnp.bfloat16),
        "b_heads": jnp.zeros((1, 8), jnp.float32),
    }


if __name__ == "__main__":
    B, C, H, W = 2, 4, 16, 16      # BATCH_SIZE, NUMBER_OF_CHANNEL, IMAGE_SIZE
    FEAT = 32                      # logical backbone feature channels (small)
    h, w = H // 2, W // 2          # backbone output spatial size

    key = jax.random.PRNGKey(0)
    kx1, kx2, kp = jax.random.split(key, 3)
    x1 = jax.random.normal(kx1, (B, C, H, W), jnp.float32)
    x2 = jax.random.normal(kx2, (B, C, H, W), jnp.float32)
    params = init_params(kp, C, FEAT, h, w)

    match_prob, transform_pred = jax.jit(sm_net_corr_forward)(params, x1, x2)
    jax.block_until_ready((match_prob, transform_pred))

    assert match_prob.shape == (B, 1)
    assert transform_pred.shape == (B, 6)
    assert bool(jnp.all(jnp.isfinite(match_prob)))
    assert bool(jnp.all(jnp.isfinite(transform_pred)))
    assert bool(jnp.all((match_prob > 0.0) & (match_prob < 1.0)))
    print("KERNEL_OK")
</pallas_src>

<mosaic_0001>
module attributes {stable_mosaic.version = 11 : i64} {
  func.func @_fused_kernel(%arg0: i32, %arg1: memref<1x16x128xbf16, #tpu.memory_space<vmem>>, %arg2: memref<16x128xbf16, #tpu.memory_space<vmem>>, %arg3: memref<1x128xf32, #tpu.memory_space<vmem>>, %arg4: memref<7x64x64xbf16, #tpu.memory_space<vmem>>, %arg5: memref<1x8xf32, #tpu.memory_space<vmem>>, %arg6: memref<1x1x8xf32, #tpu.memory_space<vmem>>) attributes {dimension_semantics = [#tpu.dimension_semantics<parallel>], iteration_bounds = array<i64: 2>, scalar_prefetch = 0 : i64, scratch_operands = 0 : i64, tpu.core_type = #tpu.core_type<tc>, window_params = [{transform_indices = @transform_0, window_bounds = array<i64: 1, 16, 128>}, {pipeline_mode = #tpu.pipeline_mode<synchronous>, transform_indices = @transform_1, window_bounds = array<i64: 16, 128>}, {pipeline_mode = #tpu.pipeline_mode<synchronous>, transform_indices = @transform_2, window_bounds = array<i64: 1, 128>}, {pipeline_mode = #tpu.pipeline_mode<synchronous>, transform_indices = @transform_3, window_bounds = array<i64: 7, 64, 64>}, {pipeline_mode = #tpu.pipeline_mode<synchronous>, transform_indices = @transform_4, window_bounds = array<i64: 1, 8>}, {transform_indices = @transform_5, window_bounds = array<i64: 1, 1, 8>}]} {
    %c0 = arith.constant 0 : index
    %c0_0 = arith.constant 0 : index
    %c0_1 = arith.constant 0 : index
    %0 = vector.load %arg1[%c0, %c0_0, %c0_1] : memref<1x16x128xbf16, #tpu.memory_space<vmem>>, vector<1x16x128xbf16>
    %1 = vector.shape_cast %0 : vector<1x16x128xbf16> to vector<16x128xbf16>
    %c0_2 = arith.constant 0 : index
    %c0_3 = arith.constant 0 : index
    %2 = vector.load %arg2[%c0_2, %c0_3] : memref<16x128xbf16, #tpu.memory_space<vmem>>, vector<16x128xbf16>
    %cst = arith.constant dense<0.000000e+00> : vector<128x128xf32>
    %3 = tpu.matmul %1, %2, %cst {dimension_numbers = #tpu.dot_dimension_numbers<[0], [0], [1], [1], [0, 1, 1, 1], [], []>} : vector<16x128xbf16>, vector<16x128xbf16>, vector<128x128xf32> -> vector<128x128xf32>
    %c0_4 = arith.constant 0 : index
    %c0_5 = arith.constant 0 : index
    %4 = vector.load %arg3[%c0_4, %c0_5] : memref<1x128xf32, #tpu.memory_space<vmem>>, vector<1x128xf32>
    %5 = vector.broadcast %4 : vector<1x128xf32> to vector<128x128xf32>
    %6 = arith.addf %3, %5 : vector<128x128xf32>
    %cst_6 = arith.constant 0.000000e+00 : f32
    %7 = vector.broadcast %cst_6 : f32 to vector<128x128xf32>
    %8 = arith.maximumf %6, %7 : vector<128x128xf32>
    %9 = vector.extract_strided_slice %8 {offsets = [0, 0], sizes = [64, 128], strides = [1, 1]} : vector<128x128xf32> to vector<64x128xf32>
    %10 = vector.extract_strided_slice %8 {offsets = [64, 0], sizes = [64, 128], strides = [1, 1]} : vector<128x128xf32> to vector<64x128xf32>
    %11 = arith.mulf %9, %9 : vector<64x128xf32>
    %cst_7 = arith.constant dense<0.000000e+00> : vector<64xf32>
    %12 = vector.multi_reduction <add>, %11, %cst_7 [1] : vector<64x128xf32> to vector<64xf32>
    %13 = vector.shape_cast %12 : vector<64xf32> to vector<64x1xf32>
    %cst_8 = arith.constant 9.99999996E-13 : f32
    %14 = vector.broadcast %cst_8 : f32 to vector<64x1xf32>
    %15 = arith.addf %13, %14 : vector<64x1xf32>
    %16 = math.rsqrt %15 : vector<64x1xf32>
    %17 = vector.broadcast %16 : vector<64x1xf32> to vector<64x128xf32>
    %18 = arith.mulf %9, %17 : vector<64x128xf32>
    %19 = arith.mulf %10, %10 : vector<64x128xf32>
    %cst_9 = arith.constant dense<0.000000e+00> : vector<64xf32>
    %20 = vector.multi_reduction <add>, %19, %cst_9 [1] : vector<64x128xf32> to vector<64xf32>
    %21 = vector.shape_cast %20 : vector<64xf32> to vector<64x1xf32>
    %cst_10 = arith.constant 9.99999996E-13 : f32
    %22 = vector.broadcast %cst_10 : f32 to vector<64x1xf32>
    %23 = arith.addf %21, %22 : vector<64x1xf32>
    %24 = math.rsqrt %23 : vector<64x1xf32>
    %25 = vector.broadcast %24 : vector<64x1xf32> to vector<64x128xf32>
    %26 = arith.mulf %10, %25 : vector<64x128xf32>
    %27 = arith.truncf %18 : vector<64x128xf32> to vector<64x128xbf16>
    %28 = arith.truncf %26 : vector<64x128xf32> to vector<64x128xbf16>
    %cst_11 = arith.constant dense<0.000000e+00> : vector<64x64xf32>
    %29 = tpu.matmul %27, %28, %cst_11 {dimension_numbers = #tpu.dot_dimension_numbers<[1], [1], [0], [0], [0, 0, 1, 0], [], []>} : vector<64x128xbf16>, vector<64x128xbf16>, vector<64x64xf32> -> vector<64x64xf32>
    %cst_12 = arith.constant 0.000000e+00 : f32
    %30 = vector.broadcast %cst_12 : f32 to vector<64x64xf32>
    %31 = arith.maximumf %29, %30 : vector<64x64xf32>
    %32 = arith.mulf %31, %31 : vector<64x64xf32>
    %cst_13 = arith.constant dense<0.000000e+00> : vector<64xf32>
    %33 = vector.multi_reduction <add>, %32, %cst_13 [0] : vector<64x64xf32> to vector<64xf32>
    %34 = vector.shape_cast %33 : vector<64xf32> to vector<1x64xf32>
    %cst_14 = arith.constant 9.99999996E-13 : f32
    %35 = vector.broadcast %cst_14 : f32 to vector<1x64xf32>
    %36 = arith.addf %34, %35 : vector<1x64xf32>
    %37 = math.rsqrt %36 : vector<1x64xf32>
    %38 = vector.broadcast %37 : vector<1x64xf32> to vector<64x64xf32>
    %39 = arith.mulf %31, %38 : vector<64x64xf32>
    %40 = tpu.iota {dimensions = array<i32: 1>} : vector<1x8xi32>
    %cst_15 = arith.constant 0.000000e+00 : f32
    %41 = vector.broadcast %cst_15 : f32 to vector<1x8xf32>
    %c0_16 = arith.constant 0 : index
    %c0_17 = arith.constant 0 : index
    %c0_18 = arith.constant 0 : index
    %42 = vector.load %arg4[%c0_16, %c0_17, %c0_18] : memref<7x64x64xbf16, #tpu.memory_space<vmem>>, vector<1x64x64xbf16>
    %43 = vector.shape_cast %42 : vector<1x64x64xbf16> to vector<64x64xbf16>
    %44 = arith.extf %43 : vector<64x64xbf16> to vector<64x64xf32>
    %45 = arith.mulf %39, %44 : vector<64x64xf32>
    %46 = vector.shape_cast %45 : vector<64x64xf32> to vector<1x64x64xf32>
    %cst_19 = arith.constant dense<0.000000e+00> : vector<1xf32>
    %47 = vector.multi_reduction <add>, %46, %cst_19 [1, 2] : vector<1x64x64xf32> to vector<1xf32>
    %48 = vector.shape_cast %47 : vector<1xf32> to vector<1x1x1xf32>
    %49 = vector.extract %48[0, 0, 0] : f32 from vector<1x1x1xf32>
    %50 = vector.broadcast %49 : f32 to vector<1x1xf32>
    %c0_i32 = arith.constant 0 : i32
    %51 = vector.broadcast %c0_i32 : i32 to vector<1x8xi32>
    %52 = arith.cmpi eq, %40, %51 : vector<1x8xi32>
    %53 = vector.shape_cast %50 : vector<1x1xf32> to vector<1x1xf32>
    %54 = vector.broadcast %53 : vector<1x1xf32> to vector<1x8xf32>
    %55 = arith.select %52, %54, %41 : vector<1x8xi1>, vector<1x8xf32>
    %c1 = arith.constant 1 : index
    %c0_20 = arith.constant 0 : index
    %c0_21 = arith.constant 0 : index
    %56 = vector.load %arg4[%c1, %c0_20, %c0_21] : memref<7x64x64xbf16, #tpu.memory_space<vmem>>, vector<1x64x64xbf16>
    %57 = vector.shape_cast %56 : vector<1x64x64xbf16> to vector<64x64xbf16>
    %58 = arith.extf %57 : vector<64x64xbf16> to vector<64x64xf32>
    %59 = arith.mulf %39, %58 : vector<64x64xf32>
    %60 = vector.shape_cast %59 : vector<64x64xf32> to vector<1x64x64xf32>
    %cst_22 = arith.constant dense<0.000000e+00> : vector<1xf32>
    %61 = vector.multi_reduction <add>, %60, %cst_22 [1, 2] : vector<1x64x64xf32> to vector<1xf32>
    %62 = vector.shape_cast %61 : vector<1xf32> to vector<1x1x1xf32>
    %63 = vector.extract %62[0, 0, 0] : f32 from vector<1x1x1xf32>
    %64 = vector.broadcast %63 : f32 to vector<1x1xf32>
    %c1_i32 = arith.constant 1 : i32
    %65 = vector.broadcast %c1_i32 : i32 to vector<1x8xi32>
    %66 = arith.cmpi eq, %40, %65 : vector<1x8xi32>
    %67 = vector.shape_cast %64 : vector<1x1xf32> to vector<1x1xf32>
    %68 = vector.broadcast %67 : vector<1x1xf32> to vector<1x8xf32>
    %69 = arith.select %66, %68, %55 : vector<1x8xi1>, vector<1x8xf32>
    %c2 = arith.constant 2 : index
    %c0_23 = arith.constant 0 : index
    %c0_24 = arith.constant 0 : index
    %70 = vector.load %arg4[%c2, %c0_23, %c0_24] : memref<7x64x64xbf16, #tpu.memory_space<vmem>>, vector<1x64x64xbf16>
    %71 = vector.shape_cast %70 : vector<1x64x64xbf16> to vector<64x64xbf16>
    %72 = arith.extf %71 : vector<64x64xbf16> to vector<64x64xf32>
    %73 = arith.mulf %39, %72 : vector<64x64xf32>
    %74 = vector.shape_cast %73 : vector<64x64xf32> to vector<1x64x64xf32>
    %cst_25 = arith.constant dense<0.000000e+00> : vector<1xf32>
    %75 = vector.multi_reduction <add>, %74, %cst_25 [1, 2] : vector<1x64x64xf32> to vector<1xf32>
    %76 = vector.shape_cast %75 : vector<1xf32> to vector<1x1x1xf32>
    %77 = vector.extract %76[0, 0, 0] : f32 from vector<1x1x1xf32>
    %78 = vector.broadcast %77 : f32 to vector<1x1xf32>
    %c2_i32 = arith.constant 2 : i32
    %79 = vector.broadcast %c2_i32 : i32 to vector<1x8xi32>
    %80 = arith.cmpi eq, %40, %79 : vector<1x8xi32>
    %81 = vector.shape_cast %78 : vector<1x1xf32> to vector<1x1xf32>
    %82 = vector.broadcast %81 : vector<1x1xf32> to vector<1x8xf32>
    %83 = arith.select %80, %82, %69 : vector<1x8xi1>, vector<1x8xf32>
    %c3 = arith.constant 3 : index
    %c0_26 = arith.constant 0 : index
    %c0_27 = arith.constant 0 : index
    %84 = vector.load %arg4[%c3, %c0_26, %c0_27] : memref<7x64x64xbf16, #tpu.memory_space<vmem>>, vector<1x64x64xbf16>
    %85 = vector.shape_cast %84 : vector<1x64x64xbf16> to vector<64x64xbf16>
    %86 = arith.extf %85 : vector<64x64xbf16> to vector<64x64xf32>
    %87 = arith.mulf %39, %86 : vector<64x64xf32>
    %88 = vector.shape_cast %87 : vector<64x64xf32> to vector<1x64x64xf32>
    %cst_28 = arith.constant dense<0.000000e+00> : vector<1xf32>
    %89 = vector.multi_reduction <add>, %88, %cst_28 [1, 2] : vector<1x64x64xf32> to vector<1xf32>
    %90 = vector.shape_cast %89 : vector<1xf32> to vector<1x1x1xf32>
    %91 = vector.extract %90[0, 0, 0] : f32 from vector<1x1x1xf32>
    %92 = vector.broadcast %91 : f32 to vector<1x1xf32>
    %c3_i32 = arith.constant 3 : i32
    %93 = vector.broadcast %c3_i32 : i32 to vector<1x8xi32>
    %94 = arith.cmpi eq, %40, %93 : vector<1x8xi32>
    %95 = vector.shape_cast %92 : vector<1x1xf32> to vector<1x1xf32>
    %96 = vector.broadcast %95 : vector<1x1xf32> to vector<1x8xf32>
    %97 = arith.select %94, %96, %83 : vector<1x8xi1>, vector<1x8xf32>
    %c4 = arith.constant 4 : index
    %c0_29 = arith.constant 0 : index
    %c0_30 = arith.constant 0 : index
    %98 = vector.load %arg4[%c4, %c0_29, %c0_30] : memref<7x64x64xbf16, #tpu.memory_space<vmem>>, vector<1x64x64xbf16>
    %99 = vector.shape_cast %98 : vector<1x64x64xbf16> to vector<64x64xbf16>
    %100 = arith.extf %99 : vector<64x64xbf16> to vector<64x64xf32>
    %101 = arith.mulf %39, %100 : vector<64x64xf32>
    %102 = vector.shape_cast %101 : vector<64x64xf32> to vector<1x64x64xf32>
    %cst_31 = arith.constant dense<0.000000e+00> : vector<1xf32>
    %103 = vector.multi_reduction <add>, %102, %cst_31 [1, 2] : vector<1x64x64xf32> to vector<1xf32>
    %104 = vector.shape_cast %103 : vector<1xf32> to vector<1x1x1xf32>
    %105 = vector.extract %104[0, 0, 0] : f32 from vector<1x1x1xf32>
    %106 = vector.broadcast %105 : f32 to vector<1x1xf32>
    %c4_i32 = arith.constant 4 : i32
    %107 = vector.broadcast %c4_i32 : i32 to vector<1x8xi32>
    %108 = arith.cmpi eq, %40, %107 : vector<1x8xi32>
    %109 = vector.shape_cast %106 : vector<1x1xf32> to vector<1x1xf32>
    %110 = vector.broadcast %109 : vector<1x1xf32> to vector<1x8xf32>
    %111 = arith.select %108, %110, %97 : vector<1x8xi1>, vector<1x8xf32>
    %c5 = arith.constant 5 : index
    %c0_32 = arith.constant 0 : index
    %c0_33 = arith.constant 0 : index
    %112 = vector.load %arg4[%c5, %c0_32, %c0_33] : memref<7x64x64xbf16, #tpu.memory_space<vmem>>, vector<1x64x64xbf16>
    %113 = vector.shape_cast %112 : vector<1x64x64xbf16> to vector<64x64xbf16>
    %114 = arith.extf %113 : vector<64x64xbf16> to vector<64x64xf32>
    %115 = arith.mulf %39, %114 : vector<64x64xf32>
    %116 = vector.shape_cast %115 : vector<64x64xf32> to vector<1x64x64xf32>
    %cst_34 = arith.constant dense<0.000000e+00> : vector<1xf32>
    %117 = vector.multi_reduction <add>, %116, %cst_34 [1, 2] : vector<1x64x64xf32> to vector<1xf32>
    %118 = vector.shape_cast %117 : vector<1xf32> to vector<1x1x1xf32>
    %119 = vector.extract %118[0, 0, 0] : f32 from vector<1x1x1xf32>
    %120 = vector.broadcast %119 : f32 to vector<1x1xf32>
    %c5_i32 = arith.constant 5 : i32
    %121 = vector.broadcast %c5_i32 : i32 to vector<1x8xi32>
    %122 = arith.cmpi eq, %40, %121 : vector<1x8xi32>
    %123 = vector.shape_cast %120 : vector<1x1xf32> to vector<1x1xf32>
    %124 = vector.broadcast %123 : vector<1x1xf32> to vector<1x8xf32>
    %125 = arith.select %122, %124, %111 : vector<1x8xi1>, vector<1x8xf32>
    %c6 = arith.constant 6 : index
    %c0_35 = arith.constant 0 : index
    %c0_36 = arith.constant 0 : index
    %126 = vector.load %arg4[%c6, %c0_35, %c0_36] : memref<7x64x64xbf16, #tpu.memory_space<vmem>>, vector<1x64x64xbf16>
    %127 = vector.shape_cast %126 : vector<1x64x64xbf16> to vector<64x64xbf16>
    %128 = arith.extf %127 : vector<64x64xbf16> to vector<64x64xf32>
    %129 = arith.mulf %39, %128 : vector<64x64xf32>
    %130 = vector.shape_cast %129 : vector<64x64xf32> to vector<1x64x64xf32>
    %cst_37 = arith.constant dense<0.000000e+00> : vector<1xf32>
    %131 = vector.multi_reduction <add>, %130, %cst_37 [1, 2] : vector<1x64x64xf32> to vector<1xf32>
    %132 = vector.shape_cast %131 : vector<1xf32> to vector<1x1x1xf32>
    %133 = vector.extract %132[0, 0, 0] : f32 from vector<1x1x1xf32>
    %134 = vector.broadcast %133 : f32 to vector<1x1xf32>
    %c6_i32 = arith.constant 6 : i32
    %135 = vector.broadcast %c6_i32 : i32 to vector<1x8xi32>
    %136 = arith.cmpi eq, %40, %135 : vector<1x8xi32>
    %137 = vector.shape_cast %134 : vector<1x1xf32> to vector<1x1xf32>
    %138 = vector.broadcast %137 : vector<1x1xf32> to vector<1x8xf32>
    %139 = arith.select %136, %138, %125 : vector<1x8xi1>, vector<1x8xf32>
    %c0_38 = arith.constant 0 : index
    %c0_39 = arith.constant 0 : index
    %140 = vector.load %arg5[%c0_38, %c0_39] : memref<1x8xf32, #tpu.memory_space<vmem>>, vector<1x8xf32>
    %141 = arith.addf %139, %140 : vector<1x8xf32>
    %c6_i32_40 = arith.constant 6 : i32
    %142 = vector.broadcast %c6_i32_40 : i32 to vector<1x8xi32>
    %143 = arith.cmpi eq, %40, %142 : vector<1x8xi32>
    %144 = arith.negf %141 : vector<1x8xf32>
    %145 = math.exp %144 : vector<1x8xf32>
    %cst_41 = arith.constant 1.000000e+00 : f32
    %146 = vector.broadcast %cst_41 : f32 to vector<1x8xf32>
    %147 = arith.addf %146, %145 : vector<1x8xf32>
    %148 = arith.divf %146, %147 : vector<1x8xf32>
    %149 = arith.select %143, %148, %141 : vector<1x8xi1>, vector<1x8xf32>
    %c0_42 = arith.constant 0 : index
    %c0_43 = arith.constant 0 : index
    %c0_44 = arith.constant 0 : index
    %150 = vector.load %arg6[%c0_42, %c0_43, %c0_44] : memref<1x1x8xf32, #tpu.memory_space<vmem>>, vector<1x1x8xf32>
    %151 = vector.shape_cast %150 : vector<1x1x8xf32> to vector<1x8xf32>
    %152 = vector.shape_cast %149 : vector<1x8xf32> to vector<1x1x8xf32>
    tpu.vector_store %arg6[%c0_42, %c0_43, %c0_44], %152 {strides = array<i32>} : memref<1x1x8xf32, #tpu.memory_space<vmem>>, vector<1x1x8xf32>,
    return
  }
  func.func @transform_0(%arg0: i32) -> (i32, i32, i32) {
    %c0_i32 = arith.constant 0 : i32
    %c0_i32_0 = arith.constant 0 : i32
    %c0_i32_1 = arith.constant 0 : i32
    return %arg0, %c0_i32, %c0_i32_0 : i32, i32, i32
  }
  func.func @transform_1(%arg0: i32) -> (i32, i32) {
    %c0_i32 = arith.constant 0 : i32
    %c0_i32_0 = arith.constant 0 : i32
    %c0_i32_1 = arith.constant 0 : i32
    return %c0_i32, %c0_i32_0 : i32, i32
  }
  func.func @transform_2(%arg0: i32) -> (i32, i32) {
    %c0_i32 = arith.constant 0 : i32
    %c0_i32_0 = arith.constant 0 : i32
    %c0_i32_1 = arith.constant 0 : i32
    return %c0_i32, %c0_i32_0 : i32, i32
  }
  func.func @transform_3(%arg0: i32) -> (i32, i32, i32) {
    %c0_i32 = arith.constant 0 : i32
    %c0_i32_0 = arith.constant 0 : i32
    %c0_i32_1 = arith.constant 0 : i32
    %c0_i32_2 = arith.constant 0 : i32
    return %c0_i32, %c0_i32_0, %c0_i32_1 : i32, i32, i32
  }
  func.func @transform_4(%arg0: i32) -> (i32, i32) {
    %c0_i32 = arith.constant 0 : i32
    %c0_i32_0 = arith.constant 0 : i32
    %c0_i32_1 = arith.constant 0 : i32
    return %c0_i32, %c0_i32_0 : i32, i32
  }
  func.func @transform_5(%arg0: i32) -> (i32, i32, i32) {
    %c0_i32 = arith.constant 0 : i32
    %c0_i32_0 = arith.constant 0 : i32
    %c0_i32_1 = arith.constant 0 : i32
    return %arg0, %c0_i32, %c0_i32_0 : i32, i32, i32
  }
}

</mosaic_0001>

<bundles_post_ra>
// kernel: sm_net_corr_forward.1
= control target key start
LH: loop header
LB: loop body
LE: loop exit
PB: predicated region body
PF: predicated region fallthrough
CT: control target
= control target key end

     0   :  { %s1439_s18 = smov 0   ;;  %s2218_s0 = inlined_call_operand.vmem [shape: bf16[2,16,128], index: 0, kind: input, shape index: {}]   ;;  %s2219_s1 = inlined_call_operand.vmem [shape: bf16[16,128], index: 1, kind: input, shape index: {}]   ;;  %s2220_s2 = inlined_call_operand.vmem [shape: f32[1,128], index: 2, kind: input, shape index: {}]   ;;  %s2221_s3 = inlined_call_operand.vmem [shape: bf16[7,64,64], index: 3, kind: input, shape index: {}]   ;;  %s2222_s4 = inlined_call_operand.vmem [shape: f32[1,8], index: 4, kind: input, shape index: {}]   ;;  %s2223_s5 = inlined_call_operand.vmem [shape: f32[2,1,8], index: 5, kind: output, shape index: {}]  }
   0x1 LB: > { %s1118_s19 = sadd.s32 4294967295, %s1407_s18   ;;  %p1122_p0 = scmp.ge.s32.totalorder %s1407_s18, 1  ;;  %s1407_s18 = sphi %s1439_s18, %s15_s18  }
   0x2   : > { %p187_p1 = scmp.lt.s32.totalorder %s1407_s18, 3 }
   0x4   : > { %p188_p2 = pnand %p1122_p0, %p187_p1 }
   0x5   : > { %p213_p3 = scmp.lt.s32.totalorder (!%p188_p2), %s1118_s19, 1 }
   0x6   : > { %191 = sbr.rel (%p188_p2) target bundleno = 1101 (0x44d), region = 40 }
   0xb   : > { %v1194_v0 = vld [vmem:[%s2219_s1] sm:$0xff]  ;;  %s2265_s19 = smov (!%p213_p3, %s1118_s19), 1  ;;  %vm258_vm0 = vcmask 130048  }
   0xc   : > { %290 = vmatpush.bf16.msra.mxu0 %v1194_v0  ;;  %1334 = vmatpush.bf16.msra.mxu2 %v1194_v0  ;;  %s1192_s22 = sshll.u32 %s2265_s19, 3  ;;  %v1469_v17 = vld [vmem:[%s2220_s2] ss:$0 sm:$0xff]  ;;  %s220_s26 = scalar_lea.vmem %s2223_s5, %s2265_s19 }
   0xd   : > { %s217_s25 = scalar_lea.vmem %s2218_s0, %s1192_s22 }
   0xe   : > { %v1193_v1 = vld [vmem:[%s217_s25] sm:$0xff] }
   0xf   : > { %236 = vxpose.xlu0.c.b16.start.end [1/1] (short) %v1193_v1, 128 }
  0xbb   : > { %v244_v2 = vpop.trf.xlu0 }
  0xbc   : > { %1133 = vmatmul.msk.bf16.vlgmr.msra.gmra.mxu0 %vm258_vm0, %v244_v2 }
  0xcb   : > { %v245_v3 = vpop.trf.xlu0 }
  0xcc   : > { %1134 = vmatmul.msk.bf16.gmra.mxu0 %vm258_vm0, %v245_v3 }
  0xdb   : > { %v246_v4 = vpop.trf.xlu0 }
  0xdc   : > { %1135 = vmatmul.msk.bf16.gmra.mxu0 %vm258_vm0, %v246_v4 }
  0xeb   : > { %v247_v5 = vpop.trf.xlu0 }
  0xec   : > { %1136 = vmatmul.msk.bf16.gmra.mxu0 %vm258_vm0, %v247_v5 }
  0xfb   : > { %v248_v6 = vpop.trf.xlu0 }
  0xfc   : > { %1137 = vmatmul.msk.bf16.vlgmr.msra.gmra.mxu2 %vm258_vm0, %v248_v6 }
 0x10b   : > { %v249_v7 = vpop.trf.xlu0 }
 0x10c   : > { %1138 = vmatmul.msk.bf16.gmra.mxu2 %vm258_vm0, %v249_v7 }
 0x11b   : > { %v250_v8 = vpop.trf.xlu0 }
 0x11c   : > { %1139 = vmatmul.msk.bf16.gmra.mxu2 %vm258_vm0, %v250_v8 }
 0x12b   : > { %v251_v9 = vpop.trf.xlu0 }
 0x12c   : > { %1140 = vmatmul.msk.bf16.gmra.mxu2 %vm258_vm0, %v251_v9 }
 0x139   : > { %v292_v13 = vpop.f32.mrf.mxu0 }
 0x13a   : > { %v293_v50 = vadd.f32 %v1469_v17, %v292_v13 }
 0x13c   : > { %v1518_v54 = vmax.f32 %v293_v50, 0.0 }
 0x13e   : > { %v348_v59 = vmul.f32 %v1518_v54, %v1518_v54 }
 0x141   : > { %v1464_v16 = vpop.f32.mrf.mxu0 }
 0x142   : > { %v295_v3 = vadd.f32 %v1469_v17, %v1464_v16 }
 0x144   : > { %v1543_v5 = vmax.f32 %v295_v3, 0.0 }
 0x146   : > { %v349_v8 = vmul.f32 %v1543_v5, %v1543_v5 }
 0x149   : > { %v297_v21 = vpop.f32.mrf.mxu0 }
 0x14a   : > { %v298_v36 = vadd.f32 %v1469_v17, %v297_v21 }
 0x14c   : > { %v1498_v41 = vmax.f32 %v298_v36, 0.0 }
 0x14e   : > { %v350_v45 = vmul.f32 %v1498_v41, %v1498_v41 }
 0x151   : > { %v299_v31 = vpop.f32.mrf.mxu0 }
 0x152   : > { %v300_v57 = vadd.f32 %v1469_v17, %v299_v31 }
 0x154   : > { %v1528_v61 = vmax.f32 %v300_v57, 0.0 }
 0x156   : > { %v351_v1 = vmul.f32 %v1528_v61, %v1528_v61 }
 0x159   : > { %v302_v40 = vpop.f32.mrf.mxu0 }
 0x15a   : > { %v303_v43 = vadd.f32 %v1469_v17, %v302_v40 }
 0x15c   : > { %v1508_v47 = vmax.f32 %v303_v43, 0.0 }
 0x15e   : > { %v352_v52 = vmul.f32 %v1508_v47, %v1508_v47 }
 0x161   : > { %v304_v49 = vpop.f32.mrf.mxu0 }
 0x162   : > { %v305_v63 = vadd.f32 %v1469_v17, %v304_v49 }
 0x164   : > { %v1537_v2 = vmax.f32 %v305_v63, 0.0 }
 0x166   : > { %v353_v4 = vmul.f32 %v1537_v2, %v1537_v2 }
 0x169   : > { %v307_v56 = vpop.f32.mrf.mxu0 }
 0x16a   : > { %v308_v58 = vadd.f32 %v1469_v17, %v307_v56 }
 0x16c   : > { %v1530_v62 = vmax.f32 %v308_v58, 0.0 }
 0x16e   : > { %v354_v0 = vmul.f32 %v1530_v62, %v1530_v62 }
 0x171   : > { %v309_v6 = vpop.f32.mrf.mxu0 }
 0x172   : > { %v310_v7 = vadd.f32 %v1469_v17, %v309_v6 }
 0x174   : > { %v1548_v9 = vmax.f32 %v310_v7, 0.0 }
 0x17f   : > { %v312_v10 = vpop.f32.mrf.mxu2 }
 0x180   : > { %v313_v28 = vadd.f32 %v1469_v17, %v312_v10  ;;  %v355_v10 = vmul.f32 %v1548_v9, %v1548_v9 }
 0x182   : > { %v1487_v33 = vmax.f32 %v313_v28, 0.0 }
 0x184   : > { %v468_v38 = vmul.f32 %v1487_v33, %v1487_v33 }
 0x187   : > { %v314_v11 = vpop.f32.mrf.mxu2 }
 0x188   : > { %v315_v51 = vadd.f32 %v1469_v17, %v314_v11 }
 0x18a   : > { %v1520_v55 = vmax.f32 %v315_v51, 0.0 }
 0x18c   : > { %v469_v60 = vmul.f32 %v1520_v55, %v1520_v55 }
 0x18f   : > { %v317_v12 = vpop.f32.mrf.mxu2 }
 0x190   : > { %v318_v22 = vadd.f32 %v1469_v17, %v317_v12 }
 0x192   : > { %v1477_v25 = vmax.f32 %v318_v22, 0.0 }
 0x194   : > { %v470_v29 = vmul.f32 %v1477_v25, %v1477_v25 }
 0x197   : > { %v319_v14 = vpop.f32.mrf.mxu2 }
 0x198   : > { %v320_v44 = vadd.f32 %v1469_v17, %v319_v14 }
 0x19a   : > { %v1510_v48 = vmax.f32 %v320_v44, 0.0 }
 0x19c   : > { %v471_v53 = vmul.f32 %v1510_v48, %v1510_v48 }
 0x19f   : > { %v322_v15 = vpop.f32.mrf.mxu2 }
 0x1a0   : > { %v323_v37 = vadd.f32 %v1469_v17, %v322_v15 }
 0x1a2   : > { %v1500_v42 = vmax.f32 %v323_v37, 0.0 }
 0x1a4   : > { %v472_v46 = vmul.f32 %v1500_v42, %v1500_v42 }
 0x1a7   : > { %v324_v18 = vpop.f32.mrf.mxu2 }
 0x1a8   : > { %v325_v19 = vadd.f32 %v1469_v17, %v324_v18 }
 0x1aa   : > { %v1472_v20 = vmax.f32 %v325_v19, 0.0 }
 0x1ac   : > { %v473_v23 = vmul.f32 %v1472_v20, %v1472_v20 }
 0x1ae   : > { %486 = vadd.xlane.f32.xlu2 %v473_v23 }
 0x1af   : > { %v327_v24 = vpop.f32.mrf.mxu2 }
 0x1b0   : > { %v328_v26 = vadd.f32 %v1469_v17, %v327_v24 }
 0x1b2   : > { %v1480_v27 = vmax.f32 %v328_v26, 0.0 }
 0x1b4   : > { %v474_v30 = vmul.f32 %v1480_v27, %v1480_v27 }
 0x1b6   : > { %480 = vadd.xlane.f32.xlu2 %v470_v29  ;;  %488 = vadd.xlane.f32.xlu0 %v474_v30 }
 0x1b7   : > { %v329_v32 = vpop.f32.mrf.mxu2 }
 0x1b8   : > { %v330_v34 = vadd.f32 %v1469_v17, %v329_v32 }
 0x1ba   : > { %v1490_v35 = vmax.f32 %v330_v34, 0.0 }
 0x1bc   : > { %v475_v39 = vmul.f32 %v1490_v35, %v1490_v35 }
 0x1be   : > { %476 = vadd.xlane.f32.xlu2 %v468_v38  ;;  %490 = vadd.xlane.f32.xlu1 %v475_v39 }
 0x1c6   : > { %360 = vadd.xlane.f32.xlu2 %v350_v45  ;;  %484 = vadd.xlane.f32.xlu1 %v472_v46 }
 0x1ce   : > { %364 = vadd.xlane.f32.xlu2 %v352_v52  ;;  %482 = vadd.xlane.f32.xlu1 %v471_v53 }
 0x1d6   : > { %356 = vadd.xlane.f32.xlu2 %v348_v59  ;;  %478 = vadd.xlane.f32.xlu1 %v469_v60 }
 0x1de   : > { %368 = vadd.xlane.f32.xlu2 %v354_v0  ;;  %362 = vadd.xlane.f32.xlu1 %v351_v1 }
 0x1e6   : > { %366 = vadd.xlane.f32.xlu1 %v353_v4 }
 0x1ee   : > { %358 = vadd.xlane.f32.xlu1 %v349_v8 }
 0x1f6   : > { %370 = vadd.xlane.f32.xlu1 %v355_v10 }
 0x221   : > { %v487_v11 = vpop.xlane.xlu2 %486 }
 0x222   : > { %v1552_v14 = vadd.f32 1e-12, %v487_v11 }
 0x224   : > { %vm556_vm8 = vweird.f32 %v1552_v14 }
 0x229   : > { %v481_v12 = vpop.xlane.xlu2 %480  ;;  %v489_v13 = vpop.xlane.xlu0 %488 }
 0x22a   : > { %v498_v15 = vadd.f32 1e-12, %v489_v13  ;;  %v1555_v21 = vadd.f32 1e-12, %v481_v12 }
 0x22c   : > { %1363 = vrsqrt.f32 %v498_v15  ;;  %vm566_vm2 = vweird.f32 %v498_v15  ;;  %vm526_vm14 = vweird.f32 %v1555_v21 }
 0x22d   : > { %1365 = vrsqrt.f32 %v1552_v14 }
 0x231   : > { %v477_v16 = vpop.xlane.xlu2 %476  ;;  %v491_v17 = vpop.xlane.xlu1 %490 }
 0x232   : > { %v499_v18 = vadd.f32 1e-12, %v491_v17  ;;  %v1364_v19 = vpop.eup %1363  ;;  %v1563_v36 = vadd.f32 1e-12, %v477_v16 }
 0x233   : > { %v1557_v22 = vpop.eup %1365  ;;  %v561_v23 = vmul.f32 %v1364_v19, %v498_v15  ;;  %vm567_vm1 = vweird.f32 %v1364_v19 }
 0x234   : > { %1367 = vrsqrt.f32 %v499_v18  ;;  %v551_v26 = vmul.f32 %v1557_v22, %v1552_v14  ;;  %vm1575_vm4 = vmor %vm566_vm2, %vm567_vm1  ;;  %vm576_vm5 = vweird.f32 %v499_v18  ;;  %vm557_vm7 = vweird.f32 %v1557_v22 }
 0x235   : > { %v562_v24 = vmul.f32 %v1364_v19, %v561_v23  ;;  %1369 = vrsqrt.f32 %v1555_v21  ;;  %vm1594_vm9 = vmor %vm556_vm8, %vm557_vm7 }
 0x236   : > { %v552_v32 = vmul.f32 %v1557_v22, %v551_v26 }
 0x237   : > { %v563_v28 = vmul.f32 0.5, %v562_v24 }
 0x238   : > { %v553_v43 = vmul.f32 0.5, %v552_v32 }
 0x239   : > { %v485_v29 = vpop.xlane.xlu1 %484  ;;  %v361_v34 = vpop.xlane.xlu2 %360  ;;  %v564_v39 = vsub.f32 1.5, %v563_v28 }
 0x23a   : > { %v496_v30 = vadd.f32 1e-12, %v485_v29  ;;  %v1368_v31 = vpop.eup %1367  ;;  %v1570_v51 = vadd.f32 1e-12, %v361_v34  ;;  %v554_v56 = vsub.f32 1.5, %v553_v43 }
 0x23b   : > { %v571_v37 = vmul.f32 %v1368_v31, %v499_v18  ;;  %v1565_v38 = vpop.eup %1369  ;;  %v565_v49 = vmul.f32 %v1364_v19, %v564_v39  ;;  %vm577_vm3 = vweird.f32 %v1368_v31 }
 0x23c   : > { %1371 = vrsqrt.f32 %v496_v30  ;;  %v521_v44 = vmul.f32 %v1565_v38, %v1555_v21  ;;  %vm578_vm6 = vmor %vm576_vm5, %vm577_vm3  ;;  %v555_v6 = vmul.f32 %v1557_v22, %v554_v56  ;;  %vm546_vm11 = vweird.f32 %v496_v30 }
 0x23d   : > { %v572_v40 = vmul.f32 %v1368_v31, %v571_v37  ;;  %1373 = vrsqrt.f32 %v1563_v36  ;;  %v569_v63 = vsel %vm1575_vm4, %v1364_v19, %v565_v49  ;;  %vm527_vm13 = vweird.f32 %v1565_v38 }
 0x23e   : > { %v522_v57 = vmul.f32 %v1565_v38, %v521_v44  ;;  %v586_v10 = vmul.f32 %v569_v63, %v1480_v27  ;;  %v559_v14 = vsel %vm1594_vm9, %v1557_v22, %v555_v6  ;;  %vm1619_vm15 = vmor %vm526_vm14, %vm527_vm13  ;;  %vm506_vm4 = vweird.f32 %v1563_v36 }
 0x23f   : > { %v573_v45 = vmul.f32 0.5, %v572_v40  ;;  %v585_v22 = vmul.f32 %v559_v14, %v1472_v20 }
 0x240   : > { %v523_v7 = vmul.f32 0.5, %v522_v57 }
 0x241   : > { %v483_v46 = vpop.xlane.xlu1 %482  ;;  %v574_v50 = vsub.f32 1.5, %v573_v45  ;;  %v365_v60 = vpop.xlane.xlu2 %364 }
 0x242   : > { %v1572_v52 = vadd.f32 1e-12, %v483_v46  ;;  %v1372_v53 = vpop.eup %1371  ;;  %v524_v27 = vsub.f32 1.5, %v523_v7 }
 0x243   : > { %v541_v59 = vmul.f32 %v1372_v53, %v496_v30  ;;  %v575_v0 = vmul.f32 %v1368_v31, %v574_v50  ;;  %v1582_v1 = vpop.eup %1373  ;;  %vm547_vm10 = vweird.f32 %v1372_v53 }
 0x244   : > { %1375 = vrsqrt.f32 %v1572_v52  ;;  %v501_v12 = vmul.f32 %v1582_v1, %v1563_v36  ;;  %vm548_vm12 = vmor %vm546_vm11, %vm547_vm10  ;;  %v525_v39 = vmul.f32 %v1565_v38, %v524_v27  ;;  %vm536_vm1 = vweird.f32 %v1572_v52 }
 0x245   : > { %1377 = vrsqrt.f32 %v1570_v51  ;;  %v542_v3 = vmul.f32 %v1372_v53, %v541_v59  ;;  %v579_v4 = vsel %vm578_vm6, %v1368_v31, %v575_v0  ;;  %vm507_vm3 = vweird.f32 %v1582_v1 }
 0x246   : > { %v587_v11 = vmul.f32 %v579_v4, %v1490_v35  ;;  %v502_v24 = vmul.f32 %v1582_v1, %v501_v12  ;;  %vm1643_vm6 = vmor %vm506_vm4, %vm507_vm3  ;;  %vm406_vm10 = vweird.f32 %v1570_v51 }
 0x247   : > { %v543_v8 = vmul.f32 0.5, %v542_v3 }
 0x248   : > { %v595_v17 = vpack.c.bf16 %v587_v11, %v586_v10  ;;  %v503_v30 = vmul.f32 0.5, %v502_v24 }
 0x249   : > { %v479_v13 = vpop.xlane.xlu1 %478  ;;  %v544_v15 = vsub.f32 1.5, %v543_v8  ;;  %v357_v31 = vpop.xlane.xlu2 %356 }
 0x24a   : > { %v1592_v16 = vadd.f32 1e-12, %v479_v13  ;;  %v1376_v18 = vpop.eup %1375  ;;  %600 = vmatpush.bf16.xpose.msra.mxu1 %v595_v17  ;;  %1335 = vmatpush.bf16.xpose.msra.mxu3 %v595_v17  ;;  %v1613_v44 = vadd.f32 1e-12, %v357_v31  ;;  %v504_v56 = vsub.f32 1.5, %v503_v30 }
 0x24b   : > { %v1598_v23 = vpop.eup %1377  ;;  %v531_v35 = vmul.f32 %v1376_v18, %v1572_v52  ;;  %v545_v26 = vmul.f32 %v1372_v53, %v544_v15  ;;  %vm537_vm0 = vweird.f32 %v1376_v18 }
 0x24c   : > { %1379 = vrsqrt.f32 %v1592_v16  ;;  %v401_v29 = vmul.f32 %v1598_v23, %v1570_v51  ;;  %vm538_vm2 = vmor %vm536_vm1, %vm537_vm0  ;;  %v505_v52 = vmul.f32 %v1582_v1, %v504_v56  ;;  %vm516_vm7 = vweird.f32 %v1592_v16 }
 0x24d   : > { %v532_v28 = vmul.f32 %v1376_v18, %v531_v35  ;;  %v549_v32 = vsel %vm548_vm12, %v1372_v53, %v545_v26  ;;  %v529_v53 = vsel %vm1619_vm15, %v1565_v38, %v525_v39  ;;  %vm407_vm9 = vweird.f32 %v1598_v23 }
 0x24e   : > { %v584_v37 = vmul.f32 %v549_v32, %v1500_v42  ;;  %v402_v20 = vmul.f32 %v1598_v23, %v401_v29  ;;  %v1624_v42 = vadd.f32 1e-12, %v365_v60  ;;  %v582_v0 = vmul.f32 %v529_v53, %v1477_v25  ;;  %vm1666_vm11 = vmor %vm406_vm10, %vm407_vm9 }
 0x24f   : > { %v533_v34 = vmul.f32 0.5, %v532_v28  ;;  %v509_v36 = vsel %vm1643_vm6, %v1582_v1, %v505_v52  ;;  %vm386_vm3 = vweird.f32 %v1613_v44 }
 0x250   : > { %v594_v46 = vpack.c.bf16 %v585_v22, %v584_v37  ;;  %v403_v59 = vmul.f32 0.5, %v402_v20  ;;  %v580_v14 = vmul.f32 %v509_v36, %v1487_v33  ;;  %vm426_vm6 = vweird.f32 %v1624_v42 }
 0x251   : > { %v363_v40 = vpop.xlane.xlu1 %362  ;;  %v534_v43 = vsub.f32 1.5, %v533_v34  ;;  %v369_v35 = vpop.xlane.xlu2 %368 }
 0x252   : > { %v1615_v45 = vadd.f32 1e-12, %v363_v40  ;;  %v1380_v49 = vpop.eup %1379  ;;  %601 = vmatpush.bf16.xpose.msra.mxu1 %v594_v46  ;;  %1336 = vmatpush.bf16.xpose.msra.mxu3 %v594_v46  ;;  %v404_v10 = vsub.f32 1.5, %v403_v59  ;;  %v1671_v37 = vadd.f32 1e-12, %v369_v35 }
 0x253   : > { %v511_v21 = vmul.f32 %v1380_v49, %v1592_v16  ;;  %v535_v57 = vmul.f32 %v1376_v18, %v534_v43  ;;  %vm517_vm5 = vweird.f32 %v1380_v49 }
 0x254   : > { %1381 = vrsqrt.f32 %v1615_v45  ;;  %vm518_vm8 = vmor %vm516_vm7, %vm517_vm5  ;;  %v405_v19 = vmul.f32 %v1598_v23, %v404_v10  ;;  %vm416_vm13 = vweird.f32 %v1615_v45 }
 0x255   : > { %1383 = vrsqrt.f32 %v1613_v44  ;;  %v512_v58 = vmul.f32 %v1380_v49, %v511_v21  ;;  %v539_v60 = vsel %vm538_vm2, %v1376_v18, %v535_v57 }
 0x256   : > { %1385 = vrsqrt.f32 %v1624_v42  ;;  %v583_v3 = vmul.f32 %v539_v60, %v1510_v48 }
 0x257   : > { %v513_v63 = vmul.f32 0.5, %v512_v58 }
 0x258   : > { %v593_v7 = vpack.c.bf16 %v583_v3, %v582_v0 }
 0x259   : > { %v367_v38 = vpop.xlane.xlu1 %366  ;;  %v514_v4 = vsub.f32 1.5, %v513_v63 }
 0x25a   : > { %v1638_v6 = vadd.f32 1e-12, %v367_v38  ;;  %v1382_v8 = vpop.eup %1381  ;;  %602 = vmatpush.bf16.xpose.msra.mxu1 %v593_v7  ;;  %1337 = vmatpush.bf16.xpose.msra.mxu3 %v593_v7 }
 0x25b   : > { %v1641_v11 = vpop.eup %1383  ;;  %v411_v48 = vmul.f32 %v1382_v8, %v1615_v45  ;;  %v515_v13 = vmul.f32 %v1380_v49, %v514_v4  ;;  %vm417_vm12 = vweird.f32 %v1382_v8 }
 0x25c   : > { %1387 = vrsqrt.f32 %v1638_v6  ;;  %v1649_v12 = vpop.eup %1385  ;;  %v381_v17 = vmul.f32 %v1641_v11, %v1613_v44  ;;  %vm418_vm14 = vmor %vm416_vm13, %vm417_vm12  ;;  %vm387_vm0 = vweird.f32 %v1641_v11  ;;  %vm436_vm2 = vweird.f32 %v1638_v6 }
 0x25d   : > { %v412_v15 = vmul.f32 %v1382_v8, %v411_v48  ;;  %v519_v18 = vsel %vm518_vm8, %v1380_v49, %v515_v13  ;;  %v421_v27 = vmul.f32 %v1649_v12, %v1624_v42  ;;  %vm427_vm1 = vweird.f32 %v1649_v12  ;;  %vm388_vm7 = vmor %vm386_vm3, %vm387_vm0 }
 0x25e   : > { %v581_v1 = vmul.f32 %v519_v18, %v1520_v55  ;;  %v382_v34 = vmul.f32 %v1641_v11, %v381_v17  ;;  %v409_v55 = vsel %vm1666_vm11, %v1598_v23, %v405_v19  ;;  %vm428_vm8 = vmor %vm426_vm6, %vm427_vm1  ;;  %vm641_vm1 = vcmask 523264  }
 0x25f   : > { %v413_v16 = vmul.f32 0.5, %v412_v15  ;;  %v422_v51 = vmul.f32 %v1649_v12, %v421_v27  ;;  %v462_v40 = vmul.f32 %v409_v55, %v1498_v41 }
 0x260   : > { %v592_v32 = vpack.c.bf16 %v581_v1, %v580_v14  ;;  %v383_v43 = vmul.f32 0.5, %v382_v34 }
 0x261   : > { %v359_v24 = vpop.xlane.xlu1 %358  ;;  %v414_v29 = vsub.f32 1.5, %v413_v16  ;;  %v423_v49 = vmul.f32 0.5, %v422_v51 }
 0x262   : > { %v1664_v26 = vpop.eup %1387  ;;  %v373_v31 = vadd.f32 1e-12, %v359_v24  ;;  %603 = vmatpush.bf16.xpose.msra.mxu1 %v592_v32  ;;  %1338 = vmatpush.bf16.xpose.msra.mxu3 %v592_v32  ;;  %v384_v56 = vsub.f32 1.5, %v383_v43 }
 0x263   : > { %v431_v33 = vmul.f32 %v1664_v26, %v1638_v6  ;;  %v415_v22 = vmul.f32 %v1382_v8, %v414_v29  ;;  %v424_v58 = vsub.f32 1.5, %v423_v49  ;;  %vm437_vm15 = vweird.f32 %v1664_v26 }
 0x264   : > { %1389 = vrsqrt.f32 %v373_v31  ;;  %v385_v63 = vmul.f32 %v1641_v11, %v384_v56  ;;  %vm1693_vm4 = vmor %vm436_vm2, %vm437_vm15  ;;  %vm396_vm9 = vweird.f32 %v373_v31  ;;  %vm446_vm15 = vweird.f32 %v1671_v37 }
 0x265   : > { %v432_v39 = vmul.f32 %v1664_v26, %v431_v33  ;;  %v419_v30 = vsel %vm418_vm14, %v1382_v8, %v415_v22  ;;  %1391 = vrsqrt.f32 %v1671_v37  ;;  %v425_v3 = vmul.f32 %v1649_v12, %v424_v58 }
 0x266   : > { %v463_v23 = vmul.f32 %v419_v30, %v1528_v61  ;;  %v389_v8 = vsel %vm388_vm7, %v1641_v11, %v385_v63 }
 0x267   : > { %v433_v46 = vmul.f32 0.5, %v432_v39  ;;  %v429_v25 = vsel %vm428_vm8, %v1649_v12, %v425_v3  ;;  %v460_v42 = vmul.f32 %v389_v8, %v1518_v54 }
 0x268   : > { %v589_v20 = vpack.c.bf16 %v463_v23, %v462_v40  ;;  %v464_v18 = vmul.f32 %v429_v25, %v1508_v47 }
 0x269   : > { %v371_v50 = vpop.xlane.xlu1 %370  ;;  %v434_v21 = vsub.f32 1.5, %v433_v46 }
 0x26a   : > { %v1390_v45 = vpop.eup %1389  ;;  %v379_v53 = vadd.f32 1e-12, %v371_v50  ;;  %609 = vmatmul.bf16.vlgmr.msra.gmra.mxu3 %v589_v20 }
 0x26b   : > { %v391_v57 = vmul.f32 %v1390_v45, %v373_v31  ;;  %v1392_v59 = vpop.eup %1391  ;;  %v435_v41 = vmul.f32 %v1664_v26, %v434_v21  ;;  %vm397_vm5 = vweird.f32 %v1390_v45 }
 0x26c   : > { %1393 = vrsqrt.f32 %v379_v53  ;;  %v441_v0 = vmul.f32 %v1392_v59, %v1671_v37  ;;  %vm398_vm10 = vmor %vm396_vm9, %vm397_vm5  ;;  %vm447_vm12 = vweird.f32 %v1392_v59  ;;  %vm456_vm13 = vweird.f32 %v379_v53 }
 0x26d   : > { %v392_v60 = vmul.f32 %v1390_v45, %v391_v57  ;;  %v439_v7 = vsel %vm1693_vm4, %v1664_v26, %v435_v41  ;;  %vm448_vm0 = vmor %vm446_vm15, %vm447_vm12 }
 0x26e   : > { %v442_v10 = vmul.f32 %v1392_v59, %v441_v0  ;;  %v465_v13 = vmul.f32 %v439_v7, %v1537_v2 }
 0x26f   : > { %v393_v61 = vmul.f32 0.5, %v392_v60 }
 0x270   : > { %v443_v19 = vmul.f32 0.5, %v442_v10  ;;  %v590_v35 = vpack.c.bf16 %v465_v13, %v464_v18  ;;  %v1761_v13 = vld [vmem:[%s2221_s3 + $0x28] sm:$0xff]  }
 0x271   : > { %v394_v52 = vsub.f32 1.5, %v393_v61 }
 0x272   : > { %v1394_v4 = vpop.eup %1393  ;;  %v444_v16 = vsub.f32 1.5, %v443_v19  ;;  %v1782_v19 = vld [vmem:[%s2221_s3 + $0x8] sm:$0xff]  }
 0x273   : > { %v451_v6 = vmul.f32 %v1394_v4, %v379_v53  ;;  %v395_v44 = vmul.f32 %v1390_v45, %v394_v52  ;;  %vm457_vm11 = vweird.f32 %v1394_v4 }
 0x274   : > { %v445_v14 = vmul.f32 %v1392_v59, %v444_v16  ;;  %vm458_vm14 = vmor %vm456_vm13, %vm457_vm11 }
 0x275   : > { %v452_v48 = vmul.f32 %v1394_v4, %v451_v6  ;;  %v399_v36 = vsel %vm398_vm10, %v1390_v45, %v395_v44 }
 0x276   : > { %v461_v15 = vmul.f32 %v399_v36, %v1543_v5  ;;  %v449_v2 = vsel %vm448_vm0, %v1392_v59, %v445_v14  ;;  %v1756_v36 = vld [vmem:[%s2221_s3 + $0x20] sm:$0xff]   ;;  %v1796_v14 = vld [vmem:[%s2221_s3 + $0x18] sm:$0xff]   ;;  %vm1069_vm0 = vcmask 57344  }
 0x277   : > { %v453_v17 = vmul.f32 0.5, %v452_v48  ;;  %v466_v5 = vmul.f32 %v449_v2, %v1530_v62  ;;  %v1213_v18 = vunpack.c.l.bf16 %v1756_v36 }
 0x278   : > { %v588_v27 = vpack.c.bf16 %v461_v15, %v460_v42  ;;  %v1766_v42 = vld [vmem:[%s2221_s3 + $0x30] sm:$0xff]   ;;  %v1771_v15 = vld [vmem:[%s2221_s3 + $0x38] sm:$0xff]  }
 0x279   : > { %v454_v11 = vsub.f32 1.5, %v453_v17  ;;  %v1776_v17 = vld [vmem:[%s2221_s3] sm:$0xff]   ;;  %v1221_v16 = vunpack.c.l.bf16 %v1766_v42  ;;  %v1222_v2 = vunpack.c.h.bf16 %v1766_v42 }
 0x27a   : > { %604 = vmatmul.bf16.vlgmr.msra.gmra.mxu1 %v588_v27  ;;  %614 = vmatmul.bf16.gmra.mxu3 %v590_v35  ;;  %v1214_v27 = vunpack.c.h.bf16 %v1756_v36  ;;  %v1217_v35 = vunpack.c.l.bf16 %v1761_v13 }
 0x27b   : > { %v455_v12 = vmul.f32 %v1394_v4, %v454_v11  ;;  %v1218_v11 = vunpack.c.h.bf16 %v1761_v13 }
 0x27d   : > { %v459_v54 = vsel %vm458_vm14, %v1394_v4, %v455_v12  ;;  %v1791_v12 = vld [vmem:[%s2221_s3 + $0x10] sm:$0xff]  }
 0x27e   : > { %v467_v47 = vmul.f32 %v459_v54, %v1548_v9 }
 0x280   : > { %v591_v1 = vpack.c.bf16 %v467_v47, %v466_v5  ;;  %v1225_v47 = vunpack.c.l.bf16 %v1771_v15  ;;  %v1226_v5 = vunpack.c.h.bf16 %v1771_v15 }
 0x28a   : > { %619 = vmatmul.bf16.gmra.mxu3 %v591_v1  ;;  %v1197_v1 = vunpack.c.l.bf16 %v1776_v17 }
 0x2ed   : > { %v610_v24 = vpop.f32.mrf.mxu3 }
 0x2ee   : > { %v1716_v33 = vmax.f32 %v610_v24, 0.0  ;;  %v1807_v24 = vld [vmem:[%s2221_s3 + $0x60] sm:$0xff]  }
 0x2f0   : > { %v635_v51 = vmul.f32 %v1716_v33, %v1716_v33 }
 0x2f2   : > { %v645_v40 = vsel %vm641_vm1, %v635_v51, 0.0  ;;  %v1206_v51 = vunpack.c.h.bf16 %v1791_v12 }
 0x2f5   : > { %v612_v26 = vpop.f32.mrf.mxu3 }
 0x2f6   : > { %v1723_v22 = vmax.f32 %v612_v26, 0.0  ;;  %v1812_v26 = vld [vmem:[%s2221_s3 + $0x68] sm:$0xff]  }
 0x2f7   : > { %v605_v28 = vpop.f32.mrf.mxu1 }
 0x2f8   : > { %v1710_v31 = vmax.f32 %v605_v28, 0.0  ;;  %v636_v43 = vmul.f32 %v1723_v22, %v1723_v22 }
 0x2fa   : > { %v633_v9 = vmul.f32 %v1710_v31, %v1710_v31  ;;  %v647_v50 = vsel %vm641_vm1, %v636_v43, 0.0 }
 0x2fc   : > { %v642_v39 = vsel %vm641_vm1, %v633_v9, 0.0  ;;  %v1822_v9 = vld [vmem:[%s2221_s3 + $0x70] sm:$0xff]  }
 0x2fd   : > { %v615_v29 = vpop.f32.mrf.mxu3 }
 0x2fe   : > { %v1729_v46 = vmax.f32 %v615_v29, 0.0  ;;  %v1198_v29 = vunpack.c.h.bf16 %v1776_v17 }
 0x2ff   : > { %v607_v32 = vpop.f32.mrf.mxu1 }
 0x300   : > { %v1712_v34 = vmax.f32 %v607_v32, 0.0  ;;  %v637_v20 = vmul.f32 %v1729_v46, %v1729_v46  ;;  %v1201_v32 = vunpack.c.l.bf16 %v1782_v19 }
 0x302   : > { %v634_v37 = vmul.f32 %v1712_v34, %v1712_v34  ;;  %v649_v56 = vsel %vm641_vm1, %v637_v20, 0.0  ;;  %v1845_v20 = vld [vmem:[%s2221_s3 + $0x48] sm:$0xff]  }
 0x304   : > { %v643_v62 = vsel %vm641_vm1, %v634_v37, 0.0  ;;  %v1202_v37 = vunpack.c.h.bf16 %v1782_v19 }
 0x305   : > { %v617_v55 = vpop.f32.mrf.mxu3  ;;  %v644_v30 = vadd.f32 %v643_v62, %v642_v39  ;;  %v1827_v62 = vld [vmem:[%s2221_s3 + $0x78] sm:$0xff]   ;;  %v1209_v39 = vunpack.c.l.bf16 %v1796_v14 }
 0x306   : > { %v1734_v45 = vmax.f32 %v617_v55, 0.0  ;;  %v1205_v55 = vunpack.c.l.bf16 %v1791_v12 }
 0x307   : > { %v646_v23 = vadd.f32 %v645_v40, %v644_v30  ;;  %v1210_v30 = vunpack.c.h.bf16 %v1796_v14  ;;  %v1836_v40 = vld [vmem:[%s2221_s3 + $0x40] sm:$0xff]  }
 0x308   : > { %v638_v57 = vmul.f32 %v1734_v45, %v1734_v45 }
 0x309   : > { %v648_v53 = vadd.f32 %v647_v50, %v646_v23  ;;  %v1245_v23 = vunpack.c.l.bf16 %v1807_v24  ;;  %v1249_v50 = vunpack.c.l.bf16 %v1812_v26 }
 0x30a   : > { %v651_v41 = vsel %vm641_vm1, %v638_v57, 0.0  ;;  %v1253_v57 = vunpack.c.l.bf16 %v1822_v9 }
 0x30b   : > { %v650_v59 = vadd.f32 %v649_v56, %v648_v53  ;;  %v1850_v53 = vld [vmem:[%s2221_s3 + $0x50] sm:$0xff]   ;;  %v1250_v56 = vunpack.c.h.bf16 %v1812_v26  ;;  %v2236_v26 = vunpack.c.l.bf16 %v1836_v40 }
 0x30d   : > { %v620_v49 = vpop.f32.mrf.mxu3  ;;  %v652_v0 = vadd.f32 %v651_v41, %v650_v59 }
 0x30e   : > { %v1736_v21 = vmax.f32 %v620_v49, 0.0  ;;  %v1246_v49 = vunpack.c.h.bf16 %v1807_v24 }
 0x310   : > { %v639_v58 = vmul.f32 %v1736_v21, %v1736_v21 }
 0x312   : > { %v653_v61 = vsel %vm641_vm1, %v639_v58, 0.0 }
 0x313   : > { %v654_v38 = vadd.f32 %v653_v61, %v652_v0  ;;  %v1908_v61 = vld [vmem:[%s2221_s3 + $0x90] sm:$0xff]  }
 0x315   : > { %v622_v60 = vpop.f32.mrf.mxu3 }
 0x316   : > { %v1745_v63 = vmax.f32 %v622_v60, 0.0  ;;  %v1859_v60 = vld [vmem:[%s2221_s3 + $0x58] sm:$0xff]  }
 0x318   : > { %v640_v3 = vmul.f32 %v1745_v63, %v1745_v63 }
 0x31a   : > { %v655_v52 = vsel %vm641_vm1, %v640_v3, 0.0 }
 0x31b   : > { %v656_v4 = vadd.f32 %v655_v52, %v654_v38  ;;  %v1867_v38 = vld [vmem:[%s2221_s3 + $0xa0] sm:$0xff]   ;;  %v1872_v52 = vld [vmem:[%s2221_s3 + $0xa8] sm:$0xff]  }
 0x31d   : > { %v657_v7 = vrot.slane %v656_v4, 4 }
 0x31f   : > { %v658_v6 = vadd.f32 %v657_v7, %v656_v4 }
 0x321   : > { %v659_v8 = vrot.slane %v658_v6, 2 }
 0x323   : > { %v660_v44 = vadd.f32 %v659_v8, %v658_v6 }
 0x325   : > { %v661_v10 = vrot.slane %v660_v44, 1 }
 0x327   : > { %v662_v25 = vadd.f32 %v661_v10, %v660_v44  ;;  %v1881_v44 = vld [vmem:[%s2221_s3 + $0xb0] sm:$0xff]  }
 0x329   : > { %v1750_v48 = vadd.f32 1e-12, %v662_v25  ;;  %v1903_v25 = vld [vmem:[%s2221_s3 + $0x88] sm:$0xff]  }
 0x32b   : > { %1395 = vrsqrt.f32 %v1750_v48  ;;  %vm670_vm2 = vweird.f32 %v1750_v48 }
 0x331   : > { %v1798_v54 = vpop.eup %1395 }
 0x332   : > { %v665_v28 = vmul.f32 %v1798_v54, %v1750_v48  ;;  %vm671_vm3 = vweird.f32 %v1798_v54 }
 0x333   : > { %vm672_vm4 = vmor %vm670_vm2, %vm671_vm3 }
 0x334   : > { %v666_v43 = vmul.f32 %v1798_v54, %v665_v28  ;;  %v1889_v28 = vld [vmem:[%s2221_s3 + $0xb8] sm:$0xff]  }
 0x336   : > { %v667_v41 = vmul.f32 0.5, %v666_v43  ;;  %v1894_v43 = vld [vmem:[%s2221_s3 + $0x80] sm:$0xff]  }
 0x338   : > { %v668_v10 = vsub.f32 1.5, %v667_v41 }
 0x33a   : > { %v669_v59 = vmul.f32 %v1798_v54, %v668_v10  ;;  %v1923_v10 = vld [vmem:[%s2221_s3 + $0x98] sm:$0xff]  }
 0x33c   : > { %v673_v41 = vsel %vm672_vm4, %v1798_v54, %v669_v59  ;;  %v1944_v54 = vld [vmem:[%s2221_s3 + $0xc0] sm:$0xff]   ;;  %v1949_v59 = vld [vmem:[%s2221_s3 + $0xc8] sm:$0xff]  }
 0x33d   : > { %v1930_v7 = vmul.f32 %v673_v41, %v1710_v31  ;;  %v1933_v4 = vmul.f32 %v673_v41, %v1712_v34  ;;  %v1936_v3 = vmul.f32 %v673_v41, %v1716_v33  ;;  %v1939_v58 = vmul.f32 %v673_v41, %v1723_v22 }
 0x33e   : > { %v1952_v31 = vmul.f32 %v673_v41, %v1729_v46  ;;  %v1955_v34 = vmul.f32 %v673_v41, %v1734_v45  ;;  %v1970_v45 = vmul.f32 %v673_v41, %v1736_v21  ;;  %v1293_v33 = vunpack.c.l.bf16 %v1944_v54  ;;  %v1984_v21 = vld [vmem:[%s2221_s3 + $0xd0] sm:$0xff]  }
 0x33f   : > { %v752_v8 = vmul.f32 %v1213_v18, %v1930_v7  ;;  %v753_v48 = vmul.f32 %v1214_v27, %v1933_v4  ;;  %v754_v46 = vmul.f32 %v1217_v35, %v1936_v3  ;;  %v1294_v22 = vunpack.c.h.bf16 %v1944_v54 }
 0x340   : > { %v755_v36 = vmul.f32 %v1218_v11, %v1939_v58  ;;  %v1298_v35 = vunpack.c.h.bf16 %v1949_v59  ;;  %v1987_v6 = vmul.f32 %v673_v41, %v1745_v63  ;;  %v756_v0 = vmul.f32 %v1221_v16, %v1952_v31 }
 0x341   : > { %v760_v18 = vsel %vm641_vm1, %v752_v8, 0.0  ;;  %v761_v27 = vsel %vm641_vm1, %v753_v48, 0.0  ;;  %v757_v13 = vmul.f32 %v1222_v2, %v1955_v34  ;;  %v763_v8 = vsel %vm641_vm1, %v754_v46, 0.0 }
 0x342   : > { %v762_v11 = vadd.f32 %v761_v27, %v760_v18  ;;  %v700_v48 = vmul.f32 %v1197_v1, %v1930_v7  ;;  %v701_v63 = vmul.f32 %v1198_v29, %v1933_v4  ;;  %v702_v41 = vmul.f32 %v1201_v32, %v1936_v3 }
 0x343   : > { %v758_v42 = vmul.f32 %v1225_v47, %v1970_v45  ;;  %v1301_v2 = vunpack.c.l.bf16 %v1984_v21  ;;  %v1302_v46 = vunpack.c.h.bf16 %v1984_v21  ;;  %v765_v18 = vsel %vm641_vm1, %v755_v36, 0.0 }
 0x344   : > { %v764_v16 = vadd.f32 %v763_v8, %v762_v11  ;;  %v703_v17 = vmul.f32 %v1202_v37, %v1939_v58  ;;  %v708_v1 = vsel %vm641_vm1, %v700_v48, 0.0  ;;  %v709_v29 = vsel %vm641_vm1, %v701_v63, 0.0 }
 0x345   : > { %v759_v32 = vmul.f32 %v1226_v5, %v1987_v6  ;;  %v767_v27 = vsel %vm641_vm1, %v756_v0, 0.0  ;;  %v710_v11 = vadd.f32 %v709_v29, %v708_v1  ;;  %v769_v8 = vsel %vm641_vm1, %v757_v13, 0.0 }
 0x346   : > { %v766_v47 = vadd.f32 %v765_v18, %v764_v16  ;;  %v704_v36 = vmul.f32 %v1205_v55, %v1952_v31  ;;  %v705_v19 = vmul.f32 %v1206_v51, %v1955_v34  ;;  %v711_v37 = vsel %vm641_vm1, %v702_v41, 0.0 }
 0x347   : > { %v712_v63 = vadd.f32 %v711_v37, %v710_v11  ;;  %v856_v15 = vmul.f32 %v1245_v23, %v1930_v7  ;;  %v857_v5 = vmul.f32 %v1246_v49, %v1933_v4  ;;  %v771_v0 = vsel %vm641_vm1, %v758_v42, 0.0 }
 0x348   : > { %v768_v48 = vadd.f32 %v767_v27, %v766_v47  ;;  %v706_v55 = vmul.f32 %v1209_v39, %v1970_v45  ;;  %v713_v12 = vsel %vm641_vm1, %v703_v17, 0.0  ;;  %v858_v51 = vmul.f32 %v1249_v50, %v1936_v3 }
 0x349   : > { %v773_v41 = vsel %vm641_vm1, %v759_v32, 0.0  ;;  %v707_v24 = vmul.f32 %v1210_v30, %v1987_v6  ;;  %v714_v23 = vadd.f32 %v713_v12, %v712_v63  ;;  %v715_v49 = vsel %vm641_vm1, %v704_v36, 0.0 }
 0x34a   : > { %v770_v13 = vadd.f32 %v769_v8, %v768_v48  ;;  %v859_v39 = vmul.f32 %v1250_v56, %v1939_v58  ;;  %v864_v42 = vsel %vm641_vm1, %v856_v15, 0.0  ;;  %v865_v16 = vsel %vm641_vm1, %v857_v5, 0.0  ;;  %v2075_v15 = vld [vmem:[%s2221_s3 + $0xd8] sm:$0xff]  }
 0x34b   : > { %v716_v50 = vadd.f32 %v715_v49, %v714_v23  ;;  %v717_v17 = vsel %vm641_vm1, %v705_v19, 0.0  ;;  %v866_v1 = vadd.f32 %v865_v16, %v864_v42  ;;  %v719_v29 = vsel %vm641_vm1, %v706_v55, 0.0 }
 0x34c   : > { %v772_v18 = vadd.f32 %v771_v0, %v770_v13  ;;  %v860_v14 = vmul.f32 %v1253_v57, %v1952_v31  ;;  %v867_v30 = vsel %vm641_vm1, %v858_v51, 0.0  ;;  %v804_v56 = vmul.f32 %v2236_v26, %v1930_v7 }
 0x34d   : > { %v718_v47 = vadd.f32 %v717_v17, %v716_v50  ;;  %v868_v27 = vadd.f32 %v867_v30, %v866_v1  ;;  %v2237_v11 = vunpack.c.h.bf16 %v1836_v40  ;;  %v721_v36 = vsel %vm641_vm1, %v707_v24, 0.0 }
 0x34e   : > { %v774_v32 = vadd.f32 %v773_v41, %v772_v18  ;;  %v2238_v19 = vunpack.c.h.bf16 %v1822_v9  ;;  %v869_v57 = vsel %vm641_vm1, %v859_v39, 0.0  ;;  %v2239_v48 = vunpack.c.l.bf16 %v1845_v20 }
 0x34f   : > { %v805_v8 = vmul.f32 %v2237_v11, %v1933_v4  ;;  %v720_v40 = vadd.f32 %v719_v29, %v718_v47  ;;  %v2240_v5 = vunpack.c.l.bf16 %v1827_v62  ;;  %v2241_v9 = vunpack.c.h.bf16 %v1827_v62 }
 0x350   : > { %v861_v37 = vmul.f32 %v2238_v19, %v1955_v34  ;;  %v806_v63 = vmul.f32 %v2239_v48, %v1936_v3  ;;  %775 = vadd.xlane.f32.xlu1 %v774_v32  ;;  %v870_v12 = vadd.f32 %v869_v57, %v868_v27  ;;  %v871_v51 = vsel %vm641_vm1, %v860_v14, 0.0 }
 0x351   : > { %v862_v0 = vmul.f32 %v2240_v5, %v1970_v45  ;;  %v863_v55 = vmul.f32 %v2241_v9, %v1987_v6  ;;  %v2242_v13 = vunpack.c.h.bf16 %v1845_v20  ;;  %v812_v24 = vsel %vm641_vm1, %v804_v56, 0.0 }
 0x352   : > { %v813_v23 = vsel %vm641_vm1, %v805_v8, 0.0  ;;  %v722_v49 = vadd.f32 %v721_v36, %v720_v40  ;;  %v872_v39 = vadd.f32 %v871_v51, %v870_v12  ;;  %v1305_v16 = vunpack.c.l.bf16 %v2075_v15 }
 0x353   : > { %v807_v41 = vmul.f32 %v2242_v13, %v1939_v58  ;;  %v814_v42 = vadd.f32 %v813_v23, %v812_v24  ;;  %v873_v18 = vsel %vm641_vm1, %v861_v37, 0.0  ;;  %v2243_v62 = vunpack.c.l.bf16 %v1850_v53 }
 0x354   : > { %v815_v17 = vsel %vm641_vm1, %v806_v63, 0.0  ;;  %v2244_v20 = vunpack.c.l.bf16 %v1867_v38  ;;  %723 = vadd.xlane.f32.xlu2 %v722_v49  ;;  %v874_v29 = vadd.f32 %v873_v18, %v872_v39  ;;  %v2245_v14 = vunpack.c.h.bf16 %v1850_v53 }
 0x355   : > { %v808_v50 = vmul.f32 %v2243_v62, %v1952_v31  ;;  %v816_v26 = vadd.f32 %v815_v17, %v814_v42  ;;  %v2246_v56 = vunpack.c.h.bf16 %v1867_v38  ;;  %v875_v47 = vsel %vm641_vm1, %v862_v0, 0.0 }
 0x356   : > { %v960_v1 = vmul.f32 %v2244_v20, %v1930_v7  ;;  %v809_v30 = vmul.f32 %v2245_v14, %v1955_v34  ;;  %v877_v27 = vsel %vm641_vm1, %v863_v55, 0.0  ;;  %v817_v11 = vsel %vm641_vm1, %v807_v41, 0.0 }
 0x357   : > { %v961_v32 = vmul.f32 %v2246_v56, %v1933_v4  ;;  %v2247_v8 = vunpack.c.l.bf16 %v1872_v52  ;;  %v876_v19 = vadd.f32 %v875_v47, %v874_v29  ;;  %v2248_v53 = vunpack.c.l.bf16 %v1859_v60 }
 0x358   : > { %v818_v57 = vadd.f32 %v817_v11, %v816_v26  ;;  %v968_v48 = vsel %vm641_vm1, %v960_v1, 0.0  ;;  %v2249_v38 = vunpack.c.h.bf16 %v1859_v60  ;;  %v819_v40 = vsel %vm641_vm1, %v808_v50, 0.0 }
 0x359   : > { %v962_v36 = vmul.f32 %v2247_v8, %v1936_v3  ;;  %v810_v37 = vmul.f32 %v2248_v53, %v1970_v45  ;;  %v2250_v5 = vunpack.c.h.bf16 %v1872_v52  ;;  %v969_v9 = vsel %vm641_vm1, %v961_v32, 0.0 }
 0x35a   : > { %v811_v63 = vmul.f32 %v2249_v38, %v1987_v6  ;;  %v878_v55 = vadd.f32 %v877_v27, %v876_v19  ;;  %v820_v12 = vadd.f32 %v819_v40, %v818_v57  ;;  %v821_v51 = vsel %vm641_vm1, %v809_v30, 0.0 }
 0x35b   : > { %v963_v0 = vmul.f32 %v2250_v5, %v1939_v58  ;;  %v970_v13 = vadd.f32 %v969_v9, %v968_v48  ;;  %v2251_v41 = vunpack.c.l.bf16 %v1881_v44  ;;  %v971_v60 = vsel %vm641_vm1, %v962_v36, 0.0 }
 0x35c   : > { %v2252_v23 = vunpack.c.l.bf16 %v1894_v43  ;;  %v2253_v52 = vunpack.c.h.bf16 %v1894_v43  ;;  %879 = vadd.xlane.f32.xlu1 %v878_v55  ;;  %v822_v42 = vadd.f32 %v821_v51, %v820_v12  ;;  %v823_v18 = vsel %vm641_vm1, %v810_v37, 0.0 }
 0x35d   : > { %v964_v24 = vmul.f32 %v2251_v41, %v1952_v31  ;;  %v972_v62 = vadd.f32 %v971_v60, %v970_v13  ;;  %v2254_v50 = vunpack.c.l.bf16 %v1903_v25  ;;  %v825_v20 = vsel %vm641_vm1, %v811_v63, 0.0 }
 0x35e   : > { %v908_v49 = vmul.f32 %v2252_v23, %v1930_v7  ;;  %v909_v39 = vmul.f32 %v2253_v52, %v1933_v4  ;;  %v2255_v1 = vunpack.c.h.bf16 %v1881_v44  ;;  %v973_v14 = vsel %vm641_vm1, %v963_v0, 0.0 }
 0x35f   : > { %v910_v17 = vmul.f32 %v2254_v50, %v1936_v3  ;;  %v2256_v43 = vunpack.c.h.bf16 %v1903_v25  ;;  %v824_v26 = vadd.f32 %v823_v18, %v822_v42  ;;  %v974_v56 = vadd.f32 %v973_v14, %v972_v62 }
 0x360   : > { %v965_v29 = vmul.f32 %v2255_v1, %v1955_v34  ;;  %v916_v32 = vsel %vm641_vm1, %v908_v49, 0.0  ;;  %v917_v47 = vsel %vm641_vm1, %v909_v39, 0.0  ;;  %v2257_v27 = vunpack.c.l.bf16 %v1889_v28 }
 0x361   : > { %v911_v30 = vmul.f32 %v2256_v43, %v1939_v58  ;;  %v975_v8 = vsel %vm641_vm1, %v964_v24, 0.0  ;;  %v2258_v44 = vunpack.c.l.bf16 %v1908_v61  ;;  %v918_v19 = vadd.f32 %v917_v47, %v916_v32 }
 0x362   : > { %v966_v11 = vmul.f32 %v2257_v27, %v1970_v45  ;;  %v826_v53 = vadd.f32 %v825_v20, %v824_v26  ;;  %v2259_v25 = vunpack.c.h.bf16 %v1889_v28  ;;  %v976_v57 = vadd.f32 %v975_v8, %v974_v56 }
 0x363   : > { %v912_v36 = vmul.f32 %v2258_v44, %v1952_v31  ;;  %v919_v48 = vsel %vm641_vm1, %v910_v17, 0.0  ;;  %v977_v38 = vsel %vm641_vm1, %v965_v29, 0.0  ;;  %v2260_v63 = vunpack.c.h.bf16 %v1908_v61 }
 0x364   : > { %v967_v37 = vmul.f32 %v2259_v25, %v1987_v6  ;;  %v920_v5 = vadd.f32 %v919_v48, %v918_v19  ;;  %v1012_v0 = vmul.f32 %v1293_v33, %v1930_v7  ;;  %827 = vadd.xlane.f32.xlu2 %v826_v53  ;;  %v978_v9 = vadd.f32 %v977_v38, %v976_v57 }
 0x365   : > { %v913_v40 = vmul.f32 %v2260_v63, %v1955_v34  ;;  %v921_v55 = vsel %vm641_vm1, %v911_v30, 0.0  ;;  %v1013_v28 = vmul.f32 %v1294_v22, %v1933_v4  ;;  %v2261_v12 = vunpack.c.l.bf16 %v1949_v59 }
 0x366   : > { %v979_v61 = vsel %vm641_vm1, %v966_v11, 0.0  ;;  %v2262_v13 = vunpack.c.l.bf16 %v1923_v10  ;;  %v922_v24 = vadd.f32 %v921_v55, %v920_v5  ;;  %v923_v7 = vsel %vm641_vm1, %v912_v36, 0.0 }
 0x367   : > { %v1014_v51 = vmul.f32 %v2261_v12, %v1936_v3  ;;  %v980_v33 = vadd.f32 %v979_v61, %v978_v9  ;;  %v1015_v60 = vmul.f32 %v1298_v35, %v1939_v58  ;;  %v1020_v4 = vsel %vm641_vm1, %v1012_v0, 0.0 }
 0x368   : > { %v914_v41 = vmul.f32 %v2262_v13, %v1970_v45  ;;  %v1021_v54 = vsel %vm641_vm1, %v1013_v28, 0.0  ;;  %v981_v3 = vsel %vm641_vm1, %v967_v37, 0.0  ;;  %v2263_v22 = vunpack.c.h.bf16 %v1923_v10 }
 0x369   : > { %v924_v49 = vadd.f32 %v923_v7, %v922_v24  ;;  %v1022_v52 = vadd.f32 %v1021_v54, %v1020_v4  ;;  %v982_v39 = vadd.f32 %v981_v3, %v980_v33  ;;  %v925_v42 = vsel %vm641_vm1, %v913_v40, 0.0 }
 0x36a   : > { %v915_v23 = vmul.f32 %v2263_v22, %v1987_v6  ;;  %v1016_v59 = vmul.f32 %v1301_v2, %v1952_v31  ;;  %v1023_v58 = vsel %vm641_vm1, %v1014_v51, 0.0  ;;  %v927_v62 = vsel %vm641_vm1, %v914_v41, 0.0 }
 0x36b   : > { %v926_v35 = vadd.f32 %v925_v42, %v924_v49  ;;  %v1024_v18 = vadd.f32 %v1023_v58, %v1022_v52  ;;  %983 = vadd.xlane.f32.xlu1 %v982_v39  ;;  %v1017_v10 = vmul.f32 %v1302_v46, %v1955_v34  ;;  %v1025_v50 = vsel %vm641_vm1, %v1015_v60, 0.0 }
 0x36c   : > { %v929_v1 = vsel %vm641_vm1, %v915_v23, 0.0  ;;  %v1306_v29 = vunpack.c.h.bf16 %v2075_v15  ;;  %v1018_v31 = vmul.f32 %v1305_v16, %v1970_v45  ;;  %v1027_v2 = vsel %vm641_vm1, %v1016_v59, 0.0 }
 0x36d   : > { %v928_v17 = vadd.f32 %v927_v62, %v926_v35  ;;  %v1026_v20 = vadd.f32 %v1025_v50, %v1024_v18  ;;  %v1029_v30 = vsel %vm641_vm1, %v1017_v10, 0.0 }
 0x36e   : > { %v1019_v21 = vmul.f32 %v1306_v29, %v1987_v6  ;;  %v1031_v46 = vsel %vm641_vm1, %v1018_v31, 0.0 }
 0x36f   : > { %v930_v14 = vadd.f32 %v929_v1, %v928_v17  ;;  %v1028_v43 = vadd.f32 %v1027_v2, %v1026_v20  ;;  %v682_v17 = vlaneseq }
 0x370   : > { %v1033_v56 = vsel %vm641_vm1, %v1019_v21, 0.0 }
 0x371   : > { %931 = vadd.xlane.f32.xlu2 %v930_v14  ;;  %v1030_v34 = vadd.f32 %v1029_v30, %v1028_v43  ;;  %v683_v20 = vand.u32 127, %v682_v17 }
 0x373   : > { %v1032_v26 = vadd.f32 %v1031_v46, %v1030_v34  ;;  %vm732_vm5 = vcmp.eq.s32.totalorder %v683_v20, 0  ;;  %vm784_vm6 = vcmp.eq.s32.totalorder %v683_v20, 1  ;;  %vm836_vm7 = vcmp.eq.s32.totalorder %v683_v20, 2 }
 0x374   : > { %vm888_vm8 = vcmp.eq.s32.totalorder %v683_v20, 3  ;;  %vm940_vm9 = vcmp.eq.s32.totalorder %v683_v20, 4  ;;  %vm992_vm10 = vcmp.eq.s32.totalorder %v683_v20, 5  ;;  %vm1044_vm11 = vcmp.eq.s32.totalorder %v683_v20, 6 }
 0x375   : > { %v1034_v32 = vadd.f32 %v1033_v56, %v1032_v26  ;;  %v1047_v56 = vld [vmem:[%s2222_s4] sm:$0x1] }
 0x379   : > { %1035 = vadd.xlane.f32.xlu2 %v1034_v32 }
 0x3c3   : > { %v776_v47 = vpop.xlane.xlu1 %775 }
 0x3c4   : > { %v777_v15 = vrot.slane %v776_v47, 4 }
 0x3c6   : > { %v778_v45 = vadd.f32 %v777_v15, %v776_v47 }
 0x3c7   : > { %v724_v16 = vpop.xlane.xlu2 %723 }
 0x3c8   : > { %v779_v27 = vrot.slane %v778_v45, 2  ;;  %v725_v11 = vrot.slane %v724_v16, 4 }
 0x3ca   : > { %v726_v8 = vadd.f32 %v725_v11, %v724_v16  ;;  %v780_v44 = vadd.f32 %v779_v27, %v778_v45 }
 0x3cc   : > { %v727_v36 = vrot.slane %v726_v8, 2  ;;  %v781_v53 = vrot.slane %v780_v44, 1 }
 0x3ce   : > { %v728_v6 = vadd.f32 %v727_v36, %v726_v8  ;;  %v782_v48 = vadd.f32 %v781_v53, %v780_v44 }
 0x3cf   : > { %v880_v19 = vpop.xlane.xlu1 %879 }
 0x3d0   : > { %v881_v25 = vrot.slane %v880_v19, 4  ;;  %v729_v57 = vrot.slane %v728_v6, 1 }
 0x3d2   : > { %v882_v37 = vadd.f32 %v881_v25, %v880_v19  ;;  %v730_v63 = vadd.f32 %v729_v57, %v728_v6 }
 0x3d4   : > { %v883_v38 = vrot.slane %v882_v37, 2  ;;  %1339 = vpush %v730_v63 }
 0x3d5   : > { %1341 = vpush %v782_v48 }
 0x3d6   : > { %v884_v0 = vadd.f32 %v883_v38, %v882_v37 }
 0x3d7   : > { %v828_v40 = vpop.xlane.xlu2 %827 }
 0x3d8   : > { %v829_v5 = vrot.slane %v828_v40, 4  ;;  %v885_v12 = vrot.slane %v884_v0, 1 }
 0x3da   : > { %v830_v9 = vadd.f32 %v829_v5, %v828_v40  ;;  %v886_v24 = vadd.f32 %v885_v12, %v884_v0 }
 0x3dc   : > { %v831_v55 = vrot.slane %v830_v9, 2 }
 0x3de   : > { %v984_v28 = vpop.xlane.xlu1 %983  ;;  %v832_v61 = vadd.f32 %v831_v55, %v830_v9 }
 0x3df   : > { %v985_v51 = vrot.slane %v984_v28, 4 }
 0x3e0   : > { %v833_v41 = vrot.slane %v832_v61, 1 }
 0x3e1   : > { %v986_v13 = vadd.f32 %v985_v51, %v984_v28 }
 0x3e2   : > { %v834_v60 = vadd.f32 %v833_v41, %v832_v61 }
 0x3e3   : > { %v987_v7 = vrot.slane %v986_v13, 2 }
 0x3e4   : > { %v932_v33 = vpop.xlane.xlu2 %931  ;;  %1343 = vpush %v834_v60 }
 0x3e5   : > { %v933_v4 = vrot.slane %v932_v33, 4  ;;  %v988_v54 = vadd.f32 %v987_v7, %v986_v13  ;;  %1345 = vpush %v886_v24 }
 0x3e7   : > { %v934_v3 = vadd.f32 %v933_v4, %v932_v33  ;;  %v989_v23 = vrot.slane %v988_v54, 1 }
 0x3e9   : > { %v935_v22 = vrot.slane %v934_v3, 2  ;;  %v990_v59 = vadd.f32 %v989_v23, %v988_v54 }
 0x3eb   : > { %v936_v49 = vadd.f32 %v935_v22, %v934_v3 }
 0x3ec   : > { %v1036_v52 = vpop.xlane.xlu2 %1035 }
 0x3ed   : > { %v1037_v39 = vrot.slane %v1036_v52, 4  ;;  %v937_v42 = vrot.slane %v936_v49, 1 }
 0x3ef   : > { %v1038_v58 = vadd.f32 %v1037_v39, %v1036_v52  ;;  %v938_v35 = vadd.f32 %v937_v42, %v936_v49 }
 0x3f1   : > { %v1039_v18 = vrot.slane %v1038_v58, 2  ;;  %1347 = vpush %v938_v35 }
 0x3f2   : > { %1349 = vpush %v990_v59 }
 0x3f3   : > { %v1040_v62 = vadd.f32 %v1039_v18, %v1038_v58 }
 0x3f5   : > { %v1041_v10 = vrot.slane %v1040_v62, 1 }
 0x3f7   : > { %v1042_v50 = vadd.f32 %v1041_v10, %v1040_v62 }
 0x3f9   : > { %1351 = vpush %v1042_v50 }
 0x405   : > { %s1340_s13 = spop %1339 }
 0x406   : > { %v733_v1 = vstv %s1340_s13  ;;  %s1342_s14 = spop %1341 }
 0x407   : > { %v734_v29 = vsel %vm732_vm5, %v733_v1, 0.0  ;;  %v785_v31 = vstv %s1342_s14 }
 0x408   : > { %v786_v14 = vsel %vm784_vm6, %v785_v31, %v734_v29 }
 0x415   : > { %s1344_s15 = spop %1343 }
 0x416   : > { %v837_v2 = vstv %s1344_s15  ;;  %s1346_s16 = spop %1345 }
 0x417   : > { %v838_v43 = vsel %vm836_vm7, %v837_v2, %v786_v14  ;;  %v889_v30 = vstv %s1346_s16 }
 0x418   : > { %v890_v21 = vsel %vm888_vm8, %v889_v30, %v838_v43 }
 0x422   : > { %s1348_s17 = spop %1347 }
 0x423   : > { %v941_v34 = vstv %s1348_s17  ;;  %s1350_s20 = spop %1349 }
 0x424   : > { %v942_v46 = vsel %vm940_vm9, %v941_v34, %v890_v21  ;;  %v993_v26 = vstv %s1350_s20 }
 0x425   : > { %v994_v32 = vsel %vm992_vm10, %v993_v26, %v942_v46 }
 0x42a   : > { %s1352_s21 = spop %1351 }
 0x42b   : > { %v1045_v47 = vstv %s1352_s21 }
 0x42c   : > { %v1046_v15 = vsel %vm1044_vm11, %v1045_v47, %v994_v32 }
 0x42d   : > { %v1048_v45 = vadd.f32 %v1047_v56, %v1046_v15 }
 0x42f   : > { %v1189_v16 = vmul.f32 -1.442695, %v1048_v45 }
 0x431   : > { %1397 = vpow2.f32 %v1189_v16 }
 0x437   : > { %v1398_v27 = vpop.eup %1397 }
 0x438   : > { %v1052_v11 = vadd.f32 1.0, %v1398_v27 }
 0x43a   : > { %1399 = vrcp.f32 %v1052_v11  ;;  %v1064_v19 = vand.u32 2147483648, %v1052_v11  ;;  %v1062_v25 = vand.u32 2147483647, %v1052_v11  ;;  %vm1058_vm13 = vweird.f32 %v1052_v11 }
 0x43c   : > { %v1065_v37 = vor.u32 1.1754944e-38, %v1064_v19  ;;  %vm1063_vm15 = vcmp.eq.f32.partialorder %v1062_v25, 8.507059e+37 }
 0x440   : > { %v1400_v8 = vpop.eup %1399 }
 0x441   : > { %v1054_v44 = vmul.f32 %v1400_v8, %v1052_v11  ;;  %vm1059_vm12 = vweird.f32 %v1400_v8 }
 0x442   : > { %vm1060_vm14 = vmor %vm1058_vm13, %vm1059_vm12 }
 0x443   : > { %v1055_v36 = vsub.f32 1.0, %v1054_v44 }
 0x445   : > { %v1056_v53 = vmul.f32 %v1400_v8, %v1055_v36 }
 0x447   : > { %v1057_v6 = vadd.f32 %v1400_v8, %v1056_v53 }
 0x449   : > { %v1061_v57 = vsel %vm1060_vm14, %v1400_v8, %v1057_v6 }
 0x44a   : > { %v1066_v48 = vsel %vm1063_vm15, %v1065_v37, %v1061_v57 }
 0x44b   : > { %v1068_v38 = vsel %vm1044_vm11, %v1066_v48, %v1048_v45 }
 0x44c   : > { %1070 = vst.msk [vmem:[%s220_s26] sm:$0x1] %vm1069_vm0, %v1068_v38 }
 0x44d PF: > { %s15_s18 = sadd.s32 1, %s1407_s18  }
 0x44e   : > { %p12_p4 = scmp.ge.s32.totalorder %s15_s18, 4  }
 0x450   :  { %14 = sbr.rel (!%p12_p4) target bundleno = 1 (0x1), region = 76 }

</bundles_post_ra>
